<compile_context>
chip_gen: v6e
topology: v6e:2x2x1
jax: 0.10.0
libtpu: 0.0.40
codegen_flags: <defaults>
</compile_context>

<pallas_src>
import functools

import jax
import jax.numpy as jnp
from jax import lax
from jax.experimental import pallas as pl
from jax.experimental.pallas import tpu as pltpu

_PAD = 128  # lane slack on each side of the image in the scratch (>= W + 1, tile-aligned)


def conv3x3_relu_kernel(x_hbm, w_ref, b_ref, o_ref, xp_ref, sem, *, H, W):
    # x_hbm : (N, Cin_p, H*W)               full input, left in HBM (pl.ANY)
    # w_ref : (Cout, 9*Cin_p)               fused im2col weights (resident)
    # b_ref : (Cout, 1) f32                 bias (resident)
    # o_ref : (nb, Cout, H*W)               output block (lane-dense)
    # xp_ref: (2, Cin_p, _PAD + H*W + _PAD) double-buffered padded image scratch
    # sem   : DMA semaphores, shape (2,)
    nb, Cout, HW = o_ref.shape
    base = pl.program_id(0) * nb

    def dma_in(j, slot):
        # HBM -> middle of the padded scratch; halo lanes stay untouched (masked below).
        return pltpu.make_async_copy(
            x_hbm.at[base + j],
            xp_ref.at[slot, :, pl.ds(_PAD, HW)],
            sem.at[slot])

    dma_in(0, 0).start()  # prime the pipeline for this grid step

    # Validity masks from a single (1, HW) iota; broadcast over channels at use-sites.
    idx = lax.broadcasted_iota(jnp.int32, (1, HW), 1)
    col = idx % W
    row_ok = {-1: idx >= W, 1: idx < HW - W}       # dh = -1 / +1
    col_ok = {-1: col != 0, 1: col != W - 1}       # dw = -1 / +1

    def tap_mask(dh, dw):
        m = None
        if dh != 0:
            m = row_ok[dh]
        if dw != 0:
            m = col_ok[dw] if m is None else (m & col_ok[dw])
        return m

    w2d = w_ref[...]          # (Cout, 9*Cin_p), input dtype
    bias = b_ref[...]         # (Cout, 1) f32

    for j in range(nb):       # static unroll over the batch block
        slot = j & 1
        dma_in(j, slot).wait()
        if j + 1 < nb:        # prefetch next element into the other slot
            dma_in(j + 1, (j + 1) & 1).start()

        # Build the (9*Cin_p, HW) im2col matrix: 9 contiguous lane-window loads of the
        # padded scratch, invalid (halo / wrapped-column) lanes zeroed via masks.
        windows = []
        for kh in range(3):
            for kw in range(3):
                dh, dw = kh - 1, kw - 1
                start = _PAD + dh * W + dw
                win = xp_ref[slot, :, pl.ds(start, HW)]      # (Cin_p, HW)
                m = tap_mask(dh, dw)
                if m is not None:
                    win = jnp.where(m, win, 0)
                windows.append(win)
        cols = jnp.concatenate(windows, axis=0)              # (9*Cin_p, HW)

        # Single fused MXU matmul with K = 9*Cin_p, bias + ReLU fused before the store.
        acc = jnp.dot(w2d, cols, preferred_element_type=jnp.float32)
        acc = acc + bias
        o_ref[j] = jnp.maximum(acc, 0.0).astype(o_ref.dtype)


def _pick_batch_block(n, max_nb=8):
    for nb in range(min(n, max_nb), 0, -1):
        if n % nb == 0:
            return nb
    return 1


def conv_module_forward(x_nchw, w_oihw, bias, *, max_nb=8):
    """Equivalent of F.relu(F.conv2d(x, w, b, stride=1, padding=1)), NCHW in/out."""
    N, Cin, H, W = x_nchw.shape
    Cout = w_oihw.shape[0]
    HW = H * W
    assert W + 1 <= _PAD, "kernel assumes W <= 127 (halo fits in the lane slack)"

    # Pad channels to a multiple of 8 so the in-kernel sublane concat is tile-aligned.
    # Zero channels contribute nothing, so this is exact (only first-layer/tiny Cin hit it).
    Cin_p = ((Cin + 7) // 8) * 8
    if Cin_p != Cin:
        x_nchw = jnp.pad(x_nchw, ((0, 0), (0, Cin_p - Cin), (0, 0), (0, 0)))
        w_oihw = jnp.pad(w_oihw, ((0, 0), (0, Cin_p - Cin), (0, 0), (0, 0)))

    x_flat = x_nchw.reshape(N, Cin_p, HW)                      # metadata-only reshape
    # OIHW -> (O, KH, KW, I) -> (O, 9*I): matches the kernel's kh-major/kw/cin ordering.
    w2d = jnp.transpose(w_oihw, (0, 2, 3, 1)).reshape(Cout, 9 * Cin_p).astype(x_nchw.dtype)
    b2 = bias.reshape(Cout, 1).astype(jnp.float32)

    nb = _pick_batch_block(N, max_nb)
    grid = (N // nb,)

    itemsize = jnp.dtype(x_nchw.dtype).itemsize
    need = (2 * Cin_p * (2 * _PAD + HW)          # padded-image scratch (2 slots)
            + 2 * nb * Cout * HW                 # double-buffered output blocks
            + 2 * (Cout * 9 * Cin_p)             # resident weights
            + 9 * Cin_p * HW                     # im2col value
            ) * itemsize + Cout * HW * 4 + Cout * 8
    vmem_limit = int(min(64 * 2**20, max(32 * 2**20, 2 * need)))

    kernel = functools.partial(conv3x3_relu_kernel, H=H, W=W)

    out_flat = pl.pallas_call(
        kernel,
        out_shape=jax.ShapeDtypeStruct((N, Cout, HW), x_nchw.dtype),
        grid_spec=pltpu.PrefetchScalarGridSpec(
            num_scalar_prefetch=0,
            grid=grid,
            in_specs=[
                pl.BlockSpec(memory_space=pl.ANY),                  # x stays in HBM
                pl.BlockSpec((Cout, 9 * Cin_p), lambda i: (0, 0)),  # resident weights
                pl.BlockSpec((Cout, 1), lambda i: (0, 0)),          # resident bias
            ],
            out_specs=pl.BlockSpec((nb, Cout, HW), lambda i: (i, 0, 0)),
            scratch_shapes=[
                pltpu.VMEM((2, Cin_p, 2 * _PAD + HW), x_nchw.dtype),
                pltpu.SemaphoreType.DMA((2,)),
            ]),
        compiler_params=pltpu.CompilerParams(
            dimension_semantics=("parallel",),
            vmem_limit_bytes=vmem_limit),
    )(x_flat, w2d, b2)

    return out_flat.reshape(N, Cout, H, W)                     # metadata-only reshape


if __name__ == "__main__":
    N, Cin, Cout, H, W = 2, 4, 8, 16, 16
    key = jax.random.PRNGKey(0)
    k1, k2, k3 = jax.random.split(key, 3)

    x = jax.random.normal(k1, (N, Cin, H, W), dtype=jnp.float32)
    # Deterministic param init (PyTorch-Conv2d-style uniform bounds).
    fan_in = Cin * 3 * 3
    bound = 1.0 / (fan_in ** 0.5)
    w = jax.random.uniform(k2, (Cout, Cin, 3, 3), minval=-bound, maxval=bound,
                           dtype=jnp.float32)
    b = jax.random.uniform(k3, (Cout,), minval=-bound, maxval=bound,
                           dtype=jnp.float32)

    fwd = jax.jit(conv_module_forward)
    out = jax.block_until_ready(fwd(x, w, b))

    # Pure-JAX reference for correctness.
    ref = lax.conv_general_dilated(
        x, w, window_strides=(1, 1), padding=((1, 1), (1, 1)),
        dimension_numbers=('NCHW', 'OIHW', 'NCHW'))
    ref = jnp.maximum(ref + b[None, :, None, None], 0.0)

    assert out.shape == (N, Cout, H, W), out.shape
    assert jnp.allclose(out, ref, atol=1e-4, rtol=1e-4), \
        float(jnp.max(jnp.abs(out - ref)))
    print("KERNEL_OK")
</pallas_src>

<mosaic_0001>
module attributes {stable_mosaic.version = 11 : i64} {
  func.func @conv3x3_relu_kernel(%arg0: i32, %arg1: memref<2x8x256xf32, #tpu.memory_space<any>>, %arg2: memref<8x72xf32, #tpu.memory_space<vmem>>, %arg3: memref<8x1xf32, #tpu.memory_space<vmem>>, %arg4: memref<2x8x256xf32, #tpu.memory_space<vmem>>, %arg5: memref<2x8x512xf32, #tpu.memory_space<vmem>>, %arg6: memref<2x!tpu.dma_semaphore, #tpu.memory_space<semaphore_mem>>) attributes {dimension_semantics = [#tpu.dimension_semantics<parallel>], iteration_bounds = array<i64: 1>, scalar_prefetch = 0 : i64, scratch_operands = 2 : i64, tpu.core_type = #tpu.core_type<tc>, window_params = [{}, {pipeline_mode = #tpu.pipeline_mode<synchronous>, transform_indices = @transform_1, window_bounds = array<i64: 8, 72>}, {pipeline_mode = #tpu.pipeline_mode<synchronous>, transform_indices = @transform_2, window_bounds = array<i64: 8, 1>}, {transform_indices = @transform_3, window_bounds = array<i64: 2, 8, 256>}]} {
    %c2_i32 = arith.constant 2 : i32
    %0 = arith.muli %arg0, %c2_i32 : i32
    %c0_i32 = arith.constant 0 : i32
    %1 = arith.addi %0, %c0_i32 : i32
    %c0_i32_0 = arith.constant 0 : i32
    %c0_i32_1 = arith.constant 0 : i32
    %c0_i32_2 = arith.constant 0 : i32
    %c0_i32_3 = arith.constant 0 : i32
    %2 = tpu.memref_slice %arg1[%1, %c0_i32_2, %c0_i32_3] : memref<2x8x256xf32, #tpu.memory_space<any>> -> memref<1x8x256xf32, #tpu.memory_space<any>>
    %3 = tpu.memref_squeeze %2 : memref<1x8x256xf32, #tpu.memory_space<any>> -> memref<8x256xf32, #tpu.memory_space<any>>
    %c0_i32_4 = arith.constant 0 : i32
    %c128_i32 = arith.constant 128 : i32
    %4 = tpu.memref_slice %arg5[%c0_i32_0, %c0_i32_4, %c128_i32] : memref<2x8x512xf32, #tpu.memory_space<vmem>> -> memref<1x8x256xf32, #tpu.memory_space<vmem>>
    %5 = tpu.memref_squeeze %4 : memref<1x8x256xf32, #tpu.memory_space<vmem>> -> memref<8x256xf32, #tpu.memory_space<vmem>>
    %6 = tpu.memref_slice %arg6[%c0_i32_1] : memref<2x!tpu.dma_semaphore, #tpu.memory_space<semaphore_mem>> -> memref<1x!tpu.dma_semaphore, #tpu.memory_space<semaphore_mem>>
    %7 = tpu.memref_squeeze %6 : memref<1x!tpu.dma_semaphore, #tpu.memory_space<semaphore_mem>> -> memref<!tpu.dma_semaphore, #tpu.memory_space<semaphore_mem>>
    tpu.enqueue_dma source(%3 : memref<8x256xf32, #tpu.memory_space<any>>) target(%5 : memref<8x256xf32, #tpu.memory_space<vmem>>) target_semaphore(%7 : memref<!tpu.dma_semaphore, #tpu.memory_space<semaphore_mem>>)
    %8 = tpu.iota {dimensions = array<i32: 1>} : vector<1x256xi32>
    %c16_i32 = arith.constant 16 : i32
    %c0_i32_5 = arith.constant 0 : i32
    %9 = arith.cmpi eq, %c16_i32, %c0_i32_5 : i32
    %c1_i32 = arith.constant 1 : i32
    %10 = arith.select %9, %c1_i32, %c16_i32 : i32
    %11 = vector.broadcast %10 : i32 to vector<1x256xi32>
    %12 = arith.remsi %8, %11 : vector<1x256xi32>
    %c0_i32_6 = arith.constant 0 : i32
    %13 = vector.broadcast %c0_i32_6 : i32 to vector<1x256xi32>
    %14 = arith.cmpi ne, %12, %13 : vector<1x256xi32>
    %c0_i32_7 = arith.constant 0 : i32
    %15 = vector.broadcast %c0_i32_7 : i32 to vector<1x256xi32>
    %16 = arith.cmpi slt, %12, %15 : vector<1x256xi32>
    %c0_i32_8 = arith.constant 0 : i32
    %17 = arith.cmpi slt, %10, %c0_i32_8 : i32
    %18 = vector.broadcast %17 : i1 to vector<1x256xi1>
    %19 = vector.broadcast %18 : vector<1x256xi1> to vector<1x256xi1>
    %20 = arith.xori %16, %19 : vector<1x256xi1>
    %21 = arith.andi %20, %14 : vector<1x256xi1>
    %22 = vector.broadcast %10 : i32 to vector<1x256xi32>
    %23 = arith.addi %12, %22 : vector<1x256xi32>
    %24 = arith.select %21, %23, %12 : vector<1x256xi1>, vector<1x256xi32>
    %c16_i32_9 = arith.constant 16 : i32
    %25 = vector.broadcast %c16_i32_9 : i32 to vector<1x256xi32>
    %26 = arith.cmpi sge, %8, %25 : vector<1x256xi32>
    %c240_i32 = arith.constant 240 : i32
    %27 = vector.broadcast %c240_i32 : i32 to vector<1x256xi32>
    %28 = arith.cmpi slt, %8, %27 : vector<1x256xi32>
    %c0_i32_10 = arith.constant 0 : i32
    %29 = vector.broadcast %c0_i32_10 : i32 to vector<1x256xi32>
    %30 = arith.cmpi ne, %24, %29 : vector<1x256xi32>
    %c15_i32 = arith.constant 15 : i32
    %31 = vector.broadcast %c15_i32 : i32 to vector<1x256xi32>
    %32 = arith.cmpi ne, %24, %31 : vector<1x256xi32>
    %c0 = arith.constant 0 : index
    %c0_11 = arith.constant 0 : index
    %33 = vector.load %arg2[%c0, %c0_11] : memref<8x72xf32, #tpu.memory_space<vmem>>, vector<8x72xf32>
    %c0_12 = arith.constant 0 : index
    %c0_13 = arith.constant 0 : index
    %34 = vector.load %arg3[%c0_12, %c0_13] : memref<8x1xf32, #tpu.memory_space<vmem>>, vector<8x1xf32>
    %c0_i32_14 = arith.constant 0 : i32
    %35 = arith.addi %0, %c0_i32_14 : i32
    %c0_i32_15 = arith.constant 0 : i32
    %c0_i32_16 = arith.constant 0 : i32
    %c0_i32_17 = arith.constant 0 : i32
    %c0_i32_18 = arith.constant 0 : i32
    %36 = tpu.memref_slice %arg1[%35, %c0_i32_17, %c0_i32_18] : memref<2x8x256xf32, #tpu.memory_space<any>> -> memref<1x8x256xf32, #tpu.memory_space<any>>
    %37 = tpu.memref_squeeze %36 : memref<1x8x256xf32, #tpu.memory_space<any>> -> memref<8x256xf32, #tpu.memory_space<any>>
    %c0_i32_19 = arith.constant 0 : i32
    %c128_i32_20 = arith.constant 128 : i32
    %38 = tpu.memref_slice %arg5[%c0_i32_15, %c0_i32_19, %c128_i32_20] : memref<2x8x512xf32, #tpu.memory_space<vmem>> -> memref<1x8x256xf32, #tpu.memory_space<vmem>>
    %39 = tpu.memref_squeeze %38 : memref<1x8x256xf32, #tpu.memory_space<vmem>> -> memref<8x256xf32, #tpu.memory_space<vmem>>
    %40 = tpu.memref_slice %arg6[%c0_i32_16] : memref<2x!tpu.dma_semaphore, #tpu.memory_space<semaphore_mem>> -> memref<1x!tpu.dma_semaphore, #tpu.memory_space<semaphore_mem>>
    %41 = tpu.memref_squeeze %40 : memref<1x!tpu.dma_semaphore, #tpu.memory_space<semaphore_mem>> -> memref<!tpu.dma_semaphore, #tpu.memory_space<semaphore_mem>>
    tpu.wait_dma2 semaphore(%41 : memref<!tpu.dma_semaphore, #tpu.memory_space<semaphore_mem>>) src(%37 : memref<8x256xf32, #tpu.memory_space<any>>) dst(%39 : memref<8x256xf32, #tpu.memory_space<vmem>>)
    %c1_i32_21 = arith.constant 1 : i32
    %42 = arith.addi %0, %c1_i32_21 : i32
    %c1_i32_22 = arith.constant 1 : i32
    %c1_i32_23 = arith.constant 1 : i32
    %c0_i32_24 = arith.constant 0 : i32
    %c0_i32_25 = arith.constant 0 : i32
    %43 = tpu.memref_slice %arg1[%42, %c0_i32_24, %c0_i32_25] : memref<2x8x256xf32, #tpu.memory_space<any>> -> memref<1x8x256xf32, #tpu.memory_space<any>>
    %44 = tpu.memref_squeeze %43 : memref<1x8x256xf32, #tpu.memory_space<any>> -> memref<8x256xf32, #tpu.memory_space<any>>
    %c0_i32_26 = arith.constant 0 : i32
    %c128_i32_27 = arith.constant 128 : i32
    %45 = tpu.memref_slice %arg5[%c1_i32_22, %c0_i32_26, %c128_i32_27] : memref<2x8x512xf32, #tpu.memory_space<vmem>> -> memref<1x8x256xf32, #tpu.memory_space<vmem>>
    %46 = tpu.memref_squeeze %45 : memref<1x8x256xf32, #tpu.memory_space<vmem>> -> memref<8x256xf32, #tpu.memory_space<vmem>>
    %47 = tpu.memref_slice %arg6[%c1_i32_23] : memref<2x!tpu.dma_semaphore, #tpu.memory_space<semaphore_mem>> -> memref<1x!tpu.dma_semaphore, #tpu.memory_space<semaphore_mem>>
    %48 = tpu.memref_squeeze %47 : memref<1x!tpu.dma_semaphore, #tpu.memory_space<semaphore_mem>> -> memref<!tpu.dma_semaphore, #tpu.memory_space<semaphore_mem>>
    tpu.enqueue_dma source(%44 : memref<8x256xf32, #tpu.memory_space<any>>) target(%46 : memref<8x256xf32, #tpu.memory_space<vmem>>) target_semaphore(%48 : memref<!tpu.dma_semaphore, #tpu.memory_space<semaphore_mem>>)
    %c0_28 = arith.constant 0 : index
    %c0_29 = arith.constant 0 : index
    %c111 = arith.constant 111 : index
    %49 = vector.load %arg5[%c0_28, %c0_29, %c111] : memref<2x8x512xf32, #tpu.memory_space<vmem>>, vector<1x8x256xf32>
    %50 = vector.shape_cast %49 : vector<1x8x256xf32> to vector<8x256xf32>
    %51 = arith.andi %26, %30 : vector<1x256xi1>
    %c0_i32_30 = arith.constant 0 : i32
    %52 = arith.sitofp %c0_i32_30 : i32 to f32
    %53 = vector.shape_cast %51 : vector<1x256xi1> to vector<1x256xi1>
    %54 = vector.broadcast %53 : vector<1x256xi1> to vector<8x256xi1>
    %55 = vector.broadcast %52 : f32 to vector<8x256xf32>
    %56 = arith.select %54, %50, %55 : vector<8x256xi1>, vector<8x256xf32>
    %c0_31 = arith.constant 0 : index
    %c0_32 = arith.constant 0 : index
    %c112 = arith.constant 112 : index
    %57 = vector.load %arg5[%c0_31, %c0_32, %c112] : memref<2x8x512xf32, #tpu.memory_space<vmem>>, vector<1x8x256xf32>
    %58 = vector.shape_cast %57 : vector<1x8x256xf32> to vector<8x256xf32>
    %c0_i32_33 = arith.constant 0 : i32
    %59 = arith.sitofp %c0_i32_33 : i32 to f32
    %60 = vector.shape_cast %26 : vector<1x256xi1> to vector<1x256xi1>
    %61 = vector.broadcast %60 : vector<1x256xi1> to vector<8x256xi1>
    %62 = vector.broadcast %59 : f32 to vector<8x256xf32>
    %63 = arith.select %61, %58, %62 : vector<8x256xi1>, vector<8x256xf32>
    %c0_34 = arith.constant 0 : index
    %c0_35 = arith.constant 0 : index
    %c113 = arith.constant 113 : index
    %64 = vector.load %arg5[%c0_34, %c0_35, %c113] : memref<2x8x512xf32, #tpu.memory_space<vmem>>, vector<1x8x256xf32>
    %65 = vector.shape_cast %64 : vector<1x8x256xf32> to vector<8x256xf32>
    %66 = arith.andi %26, %32 : vector<1x256xi1>
    %c0_i32_36 = arith.constant 0 : i32
    %67 = arith.sitofp %c0_i32_36 : i32 to f32
    %68 = vector.shape_cast %66 : vector<1x256xi1> to vector<1x256xi1>
    %69 = vector.broadcast %68 : vector<1x256xi1> to vector<8x256xi1>
    %70 = vector.broadcast %67 : f32 to vector<8x256xf32>
    %71 = arith.select %69, %65, %70 : vector<8x256xi1>, vector<8x256xf32>
    %c0_37 = arith.constant 0 : index
    %c0_38 = arith.constant 0 : index
    %c127 = arith.constant 127 : index
    %72 = vector.load %arg5[%c0_37, %c0_38, %c127] : memref<2x8x512xf32, #tpu.memory_space<vmem>>, vector<1x8x256xf32>
    %73 = vector.shape_cast %72 : vector<1x8x256xf32> to vector<8x256xf32>
    %c0_i32_39 = arith.constant 0 : i32
    %74 = arith.sitofp %c0_i32_39 : i32 to f32
    %75 = vector.shape_cast %30 : vector<1x256xi1> to vector<1x256xi1>
    %76 = vector.broadcast %75 : vector<1x256xi1> to vector<8x256xi1>
    %77 = vector.broadcast %74 : f32 to vector<8x256xf32>
    %78 = arith.select %76, %73, %77 : vector<8x256xi1>, vector<8x256xf32>
    %c0_40 = arith.constant 0 : index
    %c0_41 = arith.constant 0 : index
    %c128 = arith.constant 128 : index
    %79 = vector.load %arg5[%c0_40, %c0_41, %c128] : memref<2x8x512xf32, #tpu.memory_space<vmem>>, vector<1x8x256xf32>
    %80 = vector.shape_cast %79 : vector<1x8x256xf32> to vector<8x256xf32>
    %c0_42 = arith.constant 0 : index
    %c0_43 = arith.constant 0 : index
    %c129 = arith.constant 129 : index
    %81 = vector.load %arg5[%c0_42, %c0_43, %c129] : memref<2x8x512xf32, #tpu.memory_space<vmem>>, vector<1x8x256xf32>
    %82 = vector.shape_cast %81 : vector<1x8x256xf32> to vector<8x256xf32>
    %c0_i32_44 = arith.constant 0 : i32
    %83 = arith.sitofp %c0_i32_44 : i32 to f32
    %84 = vector.shape_cast %32 : vector<1x256xi1> to vector<1x256xi1>
    %85 = vector.broadcast %84 : vector<1x256xi1> to vector<8x256xi1>
    %86 = vector.broadcast %83 : f32 to vector<8x256xf32>
    %87 = arith.select %85, %82, %86 : vector<8x256xi1>, vector<8x256xf32>
    %c0_45 = arith.constant 0 : index
    %c0_46 = arith.constant 0 : index
    %c143 = arith.constant 143 : index
    %88 = vector.load %arg5[%c0_45, %c0_46, %c143] : memref<2x8x512xf32, #tpu.memory_space<vmem>>, vector<1x8x256xf32>
    %89 = vector.shape_cast %88 : vector<1x8x256xf32> to vector<8x256xf32>
    %90 = arith.andi %28, %30 : vector<1x256xi1>
    %c0_i32_47 = arith.constant 0 : i32
    %91 = arith.sitofp %c0_i32_47 : i32 to f32
    %92 = vector.shape_cast %90 : vector<1x256xi1> to vector<1x256xi1>
    %93 = vector.broadcast %92 : vector<1x256xi1> to vector<8x256xi1>
    %94 = vector.broadcast %91 : f32 to vector<8x256xf32>
    %95 = arith.select %93, %89, %94 : vector<8x256xi1>, vector<8x256xf32>
    %c0_48 = arith.constant 0 : index
    %c0_49 = arith.constant 0 : index
    %c144 = arith.constant 144 : index
    %96 = vector.load %arg5[%c0_48, %c0_49, %c144] : memref<2x8x512xf32, #tpu.memory_space<vmem>>, vector<1x8x256xf32>
    %97 = vector.shape_cast %96 : vector<1x8x256xf32> to vector<8x256xf32>
    %c0_i32_50 = arith.constant 0 : i32
    %98 = arith.sitofp %c0_i32_50 : i32 to f32
    %99 = vector.shape_cast %28 : vector<1x256xi1> to vector<1x256xi1>
    %100 = vector.broadcast %99 : vector<1x256xi1> to vector<8x256xi1>
    %101 = vector.broadcast %98 : f32 to vector<8x256xf32>
    %102 = arith.select %100, %97, %101 : vector<8x256xi1>, vector<8x256xf32>
    %c0_51 = arith.constant 0 : index
    %c0_52 = arith.constant 0 : index
    %c145 = arith.constant 145 : index
    %103 = vector.load %arg5[%c0_51, %c0_52, %c145] : memref<2x8x512xf32, #tpu.memory_space<vmem>>, vector<1x8x256xf32>
    %104 = vector.shape_cast %103 : vector<1x8x256xf32> to vector<8x256xf32>
    %105 = arith.andi %28, %32 : vector<1x256xi1>
    %c0_i32_53 = arith.constant 0 : i32
    %106 = arith.sitofp %c0_i32_53 : i32 to f32
    %107 = vector.shape_cast %105 : vector<1x256xi1> to vector<1x256xi1>
    %108 = vector.broadcast %107 : vector<1x256xi1> to vector<8x256xi1>
    %109 = vector.broadcast %106 : f32 to vector<8x256xf32>
    %110 = arith.select %108, %104, %109 : vector<8x256xi1>, vector<8x256xf32>
    %111 = tpu.concatenate %56, %63, %71, %78, %80, %87, %95, %102, %110 in 0 : vector<8x256xf32>, vector<8x256xf32>, vector<8x256xf32>, vector<8x256xf32>, vector<8x256xf32>, vector<8x256xf32>, vector<8x256xf32>, vector<8x256xf32>, vector<8x256xf32> -> vector<72x256xf32>
    %cst = arith.constant dense<0.000000e+00> : vector<8x256xf32>
    %112 = tpu.matmul %33, %111, %cst {dimension_numbers = #tpu.dot_dimension_numbers<[1], [0], [0], [1], [0, 0, 1, 1], [], []>} : vector<8x72xf32>, vector<72x256xf32>, vector<8x256xf32> -> vector<8x256xf32>
    %113 = vector.broadcast %34 : vector<8x1xf32> to vector<8x256xf32>
    %114 = arith.addf %112, %113 : vector<8x256xf32>
    %cst_54 = arith.constant 0.000000e+00 : f32
    %115 = vector.broadcast %cst_54 : f32 to vector<8x256xf32>
    %116 = arith.maximumf %114, %115 : vector<8x256xf32>
    %c0_55 = arith.constant 0 : index
    %c0_56 = arith.constant 0 : index
    %c0_57 = arith.constant 0 : index
    %117 = vector.load %arg4[%c0_55, %c0_56, %c0_57] : memref<2x8x256xf32, #tpu.memory_space<vmem>>, vector<1x8x256xf32>
    %118 = vector.shape_cast %117 : vector<1x8x256xf32> to vector<8x256xf32>
    %119 = vector.shape_cast %116 : vector<8x256xf32> to vector<1x8x256xf32>
    tpu.vector_store %arg4[%c0_55, %c0_56, %c0_57], %119 {strides = array<i32>} : memref<2x8x256xf32, #tpu.memory_space<vmem>>, vector<1x8x256xf32>,
    %c1_i32_58 = arith.constant 1 : i32
    %120 = arith.addi %0, %c1_i32_58 : i32
    %c1_i32_59 = arith.constant 1 : i32
    %c1_i32_60 = arith.constant 1 : i32
    %c0_i32_61 = arith.constant 0 : i32
    %c0_i32_62 = arith.constant 0 : i32
    %121 = tpu.memref_slice %arg1[%120, %c0_i32_61, %c0_i32_62] : memref<2x8x256xf32, #tpu.memory_space<any>> -> memref<1x8x256xf32, #tpu.memory_space<any>>
    %122 = tpu.memref_squeeze %121 : memref<1x8x256xf32, #tpu.memory_space<any>> -> memref<8x256xf32, #tpu.memory_space<any>>
    %c0_i32_63 = arith.constant 0 : i32
    %c128_i32_64 = arith.constant 128 : i32
    %123 = tpu.memref_slice %arg5[%c1_i32_59, %c0_i32_63, %c128_i32_64] : memref<2x8x512xf32, #tpu.memory_space<vmem>> -> memref<1x8x256xf32, #tpu.memory_space<vmem>>
    %124 = tpu.memref_squeeze %123 : memref<1x8x256xf32, #tpu.memory_space<vmem>> -> memref<8x256xf32, #tpu.memory_space<vmem>>
    %125 = tpu.memref_slice %arg6[%c1_i32_60] : memref<2x!tpu.dma_semaphore, #tpu.memory_space<semaphore_mem>> -> memref<1x!tpu.dma_semaphore, #tpu.memory_space<semaphore_mem>>
    %126 = tpu.memref_squeeze %125 : memref<1x!tpu.dma_semaphore, #tpu.memory_space<semaphore_mem>> -> memref<!tpu.dma_semaphore, #tpu.memory_space<semaphore_mem>>
    tpu.wait_dma2 semaphore(%126 : memref<!tpu.dma_semaphore, #tpu.memory_space<semaphore_mem>>) src(%122 : memref<8x256xf32, #tpu.memory_space<any>>) dst(%124 : memref<8x256xf32, #tpu.memory_space<vmem>>)
    %c1 = arith.constant 1 : index
    %c0_65 = arith.constant 0 : index
    %c111_66 = arith.constant 111 : index
    %127 = vector.load %arg5[%c1, %c0_65, %c111_66] : memref<2x8x512xf32, #tpu.memory_space<vmem>>, vector<1x8x256xf32>
    %128 = vector.shape_cast %127 : vector<1x8x256xf32> to vector<8x256xf32>
    %129 = arith.andi %26, %30 : vector<1x256xi1>
    %c0_i32_67 = arith.constant 0 : i32
    %130 = arith.sitofp %c0_i32_67 : i32 to f32
    %131 = vector.shape_cast %129 : vector<1x256xi1> to vector<1x256xi1>
    %132 = vector.broadcast %131 : vector<1x256xi1> to vector<8x256xi1>
    %133 = vector.broadcast %130 : f32 to vector<8x256xf32>
    %134 = arith.select %132, %128, %133 : vector<8x256xi1>, vector<8x256xf32>
    %c1_68 = arith.constant 1 : index
    %c0_69 = arith.constant 0 : index
    %c112_70 = arith.constant 112 : index
    %135 = vector.load %arg5[%c1_68, %c0_69, %c112_70] : memref<2x8x512xf32, #tpu.memory_space<vmem>>, vector<1x8x256xf32>
    %136 = vector.shape_cast %135 : vector<1x8x256xf32> to vector<8x256xf32>
    %c0_i32_71 = arith.constant 0 : i32
    %137 = arith.sitofp %c0_i32_71 : i32 to f32
    %138 = vector.shape_cast %26 : vector<1x256xi1> to vector<1x256xi1>
    %139 = vector.broadcast %138 : vector<1x256xi1> to vector<8x256xi1>
    %140 = vector.broadcast %137 : f32 to vector<8x256xf32>
    %141 = arith.select %139, %136, %140 : vector<8x256xi1>, vector<8x256xf32>
    %c1_72 = arith.constant 1 : index
    %c0_73 = arith.constant 0 : index
    %c113_74 = arith.constant 113 : index
    %142 = vector.load %arg5[%c1_72, %c0_73, %c113_74] : memref<2x8x512xf32, #tpu.memory_space<vmem>>, vector<1x8x256xf32>
    %143 = vector.shape_cast %142 : vector<1x8x256xf32> to vector<8x256xf32>
    %144 = arith.andi %26, %32 : vector<1x256xi1>
    %c0_i32_75 = arith.constant 0 : i32
    %145 = arith.sitofp %c0_i32_75 : i32 to f32
    %146 = vector.shape_cast %144 : vector<1x256xi1> to vector<1x256xi1>
    %147 = vector.broadcast %146 : vector<1x256xi1> to vector<8x256xi1>
    %148 = vector.broadcast %145 : f32 to vector<8x256xf32>
    %149 = arith.select %147, %143, %148 : vector<8x256xi1>, vector<8x256xf32>
    %c1_76 = arith.constant 1 : index
    %c0_77 = arith.constant 0 : index
    %c127_78 = arith.constant 127 : index
    %150 = vector.load %arg5[%c1_76, %c0_77, %c127_78] : memref<2x8x512xf32, #tpu.memory_space<vmem>>, vector<1x8x256xf32>
    %151 = vector.shape_cast %150 : vector<1x8x256xf32> to vector<8x256xf32>
    %c0_i32_79 = arith.constant 0 : i32
    %152 = arith.sitofp %c0_i32_79 : i32 to f32
    %153 = vector.shape_cast %30 : vector<1x256xi1> to vector<1x256xi1>
    %154 = vector.broadcast %153 : vector<1x256xi1> to vector<8x256xi1>
    %155 = vector.broadcast %152 : f32 to vector<8x256xf32>
    %156 = arith.select %154, %151, %155 : vector<8x256xi1>, vector<8x256xf32>
    %c1_80 = arith.constant 1 : index
    %c0_81 = arith.constant 0 : index
    %c128_82 = arith.constant 128 : index
    %157 = vector.load %arg5[%c1_80, %c0_81, %c128_82] : memref<2x8x512xf32, #tpu.memory_space<vmem>>, vector<1x8x256xf32>
    %158 = vector.shape_cast %157 : vector<1x8x256xf32> to vector<8x256xf32>
    %c1_83 = arith.constant 1 : index
    %c0_84 = arith.constant 0 : index
    %c129_85 = arith.constant 129 : index
    %159 = vector.load %arg5[%c1_83, %c0_84, %c129_85] : memref<2x8x512xf32, #tpu.memory_space<vmem>>, vector<1x8x256xf32>
    %160 = vector.shape_cast %159 : vector<1x8x256xf32> to vector<8x256xf32>
    %c0_i32_86 = arith.constant 0 : i32
    %161 = arith.sitofp %c0_i32_86 : i32 to f32
    %162 = vector.shape_cast %32 : vector<1x256xi1> to vector<1x256xi1>
    %163 = vector.broadcast %162 : vector<1x256xi1> to vector<8x256xi1>
    %164 = vector.broadcast %161 : f32 to vector<8x256xf32>
    %165 = arith.select %163, %160, %164 : vector<8x256xi1>, vector<8x256xf32>
    %c1_87 = arith.constant 1 : index
    %c0_88 = arith.constant 0 : index
    %c143_89 = arith.constant 143 : index
    %166 = vector.load %arg5[%c1_87, %c0_88, %c143_89] : memref<2x8x512xf32, #tpu.memory_space<vmem>>, vector<1x8x256xf32>
    %167 = vector.shape_cast %166 : vector<1x8x256xf32> to vector<8x256xf32>
    %168 = arith.andi %28, %30 : vector<1x256xi1>
    %c0_i32_90 = arith.constant 0 : i32
    %169 = arith.sitofp %c0_i32_90 : i32 to f32
    %170 = vector.shape_cast %168 : vector<1x256xi1> to vector<1x256xi1>
    %171 = vector.broadcast %170 : vector<1x256xi1> to vector<8x256xi1>
    %172 = vector.broadcast %169 : f32 to vector<8x256xf32>
    %173 = arith.select %171, %167, %172 : vector<8x256xi1>, vector<8x256xf32>
    %c1_91 = arith.constant 1 : index
    %c0_92 = arith.constant 0 : index
    %c144_93 = arith.constant 144 : index
    %174 = vector.load %arg5[%c1_91, %c0_92, %c144_93] : memref<2x8x512xf32, #tpu.memory_space<vmem>>, vector<1x8x256xf32>
    %175 = vector.shape_cast %174 : vector<1x8x256xf32> to vector<8x256xf32>
    %c0_i32_94 = arith.constant 0 : i32
    %176 = arith.sitofp %c0_i32_94 : i32 to f32
    %177 = vector.shape_cast %28 : vector<1x256xi1> to vector<1x256xi1>
    %178 = vector.broadcast %177 : vector<1x256xi1> to vector<8x256xi1>
    %179 = vector.broadcast %176 : f32 to vector<8x256xf32>
    %180 = arith.select %178, %175, %179 : vector<8x256xi1>, vector<8x256xf32>
    %c1_95 = arith.constant 1 : index
    %c0_96 = arith.constant 0 : index
    %c145_97 = arith.constant 145 : index
    %181 = vector.load %arg5[%c1_95, %c0_96, %c145_97] : memref<2x8x512xf32, #tpu.memory_space<vmem>>, vector<1x8x256xf32>
    %182 = vector.shape_cast %181 : vector<1x8x256xf32> to vector<8x256xf32>
    %183 = arith.andi %28, %32 : vector<1x256xi1>
    %c0_i32_98 = arith.constant 0 : i32
    %184 = arith.sitofp %c0_i32_98 : i32 to f32
    %185 = vector.shape_cast %183 : vector<1x256xi1> to vector<1x256xi1>
    %186 = vector.broadcast %185 : vector<1x256xi1> to vector<8x256xi1>
    %187 = vector.broadcast %184 : f32 to vector<8x256xf32>
    %188 = arith.select %186, %182, %187 : vector<8x256xi1>, vector<8x256xf32>
    %189 = tpu.concatenate %134, %141, %149, %156, %158, %165, %173, %180, %188 in 0 : vector<8x256xf32>, vector<8x256xf32>, vector<8x256xf32>, vector<8x256xf32>, vector<8x256xf32>, vector<8x256xf32>, vector<8x256xf32>, vector<8x256xf32>, vector<8x256xf32> -> vector<72x256xf32>
    %cst_99 = arith.constant dense<0.000000e+00> : vector<8x256xf32>
    %190 = tpu.matmul %33, %189, %cst_99 {dimension_numbers = #tpu.dot_dimension_numbers<[1], [0], [0], [1], [0, 0, 1, 1], [], []>} : vector<8x72xf32>, vector<72x256xf32>, vector<8x256xf32> -> vector<8x256xf32>
    %191 = vector.broadcast %34 : vector<8x1xf32> to vector<8x256xf32>
    %192 = arith.addf %190, %191 : vector<8x256xf32>
    %cst_100 = arith.constant 0.000000e+00 : f32
    %193 = vector.broadcast %cst_100 : f32 to vector<8x256xf32>
    %194 = arith.maximumf %192, %193 : vector<8x256xf32>
    %c1_101 = arith.constant 1 : index
    %c0_102 = arith.constant 0 : index
    %c0_103 = arith.constant 0 : index
    %195 = vector.load %arg4[%c1_101, %c0_102, %c0_103] : memref<2x8x256xf32, #tpu.memory_space<vmem>>, vector<1x8x256xf32>
    %196 = vector.shape_cast %195 : vector<1x8x256xf32> to vector<8x256xf32>
    %197 = vector.shape_cast %194 : vector<8x256xf32> to vector<1x8x256xf32>
    tpu.vector_store %arg4[%c1_101, %c0_102, %c0_103], %197 {strides = array<i32>} : memref<2x8x256xf32, #tpu.memory_space<vmem>>, vector<1x8x256xf32>,
    return
  }
  func.func @transform_1(%arg0: i32) -> (i32, i32) {
    %c0_i32 = arith.constant 0 : i32
    %c0_i32_0 = arith.constant 0 : i32
    %c0_i32_1 = arith.constant 0 : i32
    return %c0_i32, %c0_i32_0 : i32, i32
  }
  func.func @transform_2(%arg0: i32) -> (i32, i32) {
    %c0_i32 = arith.constant 0 : i32
    %c0_i32_0 = arith.constant 0 : i32
    %c0_i32_1 = arith.constant 0 : i32
    return %c0_i32, %c0_i32_0 : i32, i32
  }
  func.func @transform_3(%arg0: i32) -> (i32, i32, i32) {
    %c0_i32 = arith.constant 0 : i32
    %c0_i32_0 = arith.constant 0 : i32
    %c0_i32_1 = arith.constant 0 : i32
    return %arg0, %c0_i32, %c0_i32_0 : i32, i32, i32
  }
}

</mosaic_0001>

<bundles_post_ra>
// kernel: conv_module_forward.1
= control target key start
LH: loop header
LB: loop body
LE: loop exit
PB: predicated region body
PF: predicated region fallthrough
CT: control target
= control target key end

     0   :  { %s948_s0 = inlined_call_operand.vmem [shape: f32[2,8,256], index: 0, kind: input, shape index: {}]   ;;  %s949_s1 = inlined_call_operand.vmem [shape: f32[8,72], index: 1, kind: input, shape index: {}]   ;;  %s950_s2 = inlined_call_operand.vmem [shape: f32[8,1], index: 2, kind: input, shape index: {}]   ;;  %s951_s3 = inlined_call_operand.vmem [shape: f32[2,8,256], index: 3, kind: output, shape index: {}]  }
   0x1   :  { %v50_v0 = vld [vmem:[%s948_s0] sm:$0xff]  ;;  %v52_v1 = vld [vmem:[%s948_s0 + $0x8] sm:$0xff] }
   0x2   :  { %51 = vst [vmem:[#allocation2 + $0x20] sm:$0xff] %v50_v0  ;;  %53 = vst [vmem:[#allocation2 + $0x8] sm:$0xff] %v52_v1 }
   0x3   :  { %61 = vsyncadd [#allocation3], 256  ;;  %v62_v2 = vlaneseq  ;;  %v698_v3 = vld [vmem:[%s949_s1] sm:$0xff] }
   0x4   :  { %v98_v4 = vld [vmem:[%s950_s2] sm:$0xff] }
   0x5   :  { %v703_v5 = vand.u32 127, %v62_v2 }
   0x7   :  { %v706_v6 = vadd.s32 128, %v703_v5  ;;  %v69_v7 = vand.u32 15, %v703_v5  ;;  %vm89_vm0 = vcmp.ge.s32.totalorder %v703_v5, 16 }
   0x9   :  { %v76_v8 = vand.u32 15, %v706_v6  ;;  %vm92_vm1 = vcmp.lt.s32.totalorder %v706_v6, 240  ;;  %vm712_vm2 = vcmp.ne.s32.totalorder %v69_v7, 0  ;;  %vm716_vm3 = vcmp.ne.s32.totalorder %v69_v7, 15 }
   0xb   :  { %vm720_vm4 = vcmp.ne.s32.totalorder %v76_v8, 0  ;;  %vm724_vm5 = vcmp.ne.s32.totalorder %v76_v8, 15 }
   0xc   :  { %655 = dma.done.wait [#allocation3], 256 }
   0xd   :  { %656 = vsyncadd [#allocation3], 4294967040  ;;  %v607_v13 = vld [vmem:[%s948_s0 + $0x10] sm:$0xff]  ;;  %v608_v14 = vld [vmem:[%s948_s0 + $0x18] sm:$0xff]  ;;  %s659_s22 = smov 111  }
   0xe   :  { %143 = vst [vmem:[#allocation2 + $0x30] sm:$0xff] %v607_v13  ;;  %145 = vst [vmem:[#allocation2 + $0x28] sm:$0xff] %v608_v14  ;;  %v734_v15 = vld [vmem:[#allocation2 + $0x8] sm:$0xff]  ;;  %v736_v16 = vld [vmem:[#allocation2 + $0x20] sm:$0xff] }
   0xf   :  { %295 = vrot.lane.b32.xlu0 %v734_v15, %s659_s22  ;;  %293 = vrot.lane.b32.xlu1 %v736_v16, %s659_s22 }
  0x10   :  { %153 = vsyncadd [#allocation3 + $0x1], 256  ;;  %v232_v17 = vld [vmem:[#allocation2] sm:$0xff]  ;;  %s660_s23 = smov 112   ;;  %s661_s0 = smov 113   ;;  %v154_v18 = vld [vmem:[#allocation2 + $0x10] sm:$0xff] }
  0x11   :  { %s662_s24 = smov 127   ;;  %s663_s25 = smov 1   ;;  %v665_v19 = vmov 0.0   ;;  %v666_v20 = vmov 0   ;;  %vm783_vm6 = vmand %vm92_vm1, %vm724_vm5  ;;  %vm299_vm7 = vcmask 908288   ;;  %vm280_vm8 = vcmask 916480  }
  0x12   :  { %s664_s26 = smov 15   ;;  %379 = vmatprep.mubr.f32.mxu0 %v665_v19  ;;  %654 = vset.pattern.permute.xlu0 %v666_v20  ;;  %s667_s27 = smov 16   ;;  %vm263_vm9 = vcmask 924672   ;;  %vm801_vm10 = vmand %vm92_vm1, %vm720_vm4  ;;  %vm954_vm11 = vcmask 1039360   ;;  %vm953_vm12 = vcmask 7168   ;;  %vm952_vm13 = vcmask 121856  }
  0x13   :  { %297 = vrot.lane.b32.xlu0 %v232_v17, %s659_s22  ;;  %276 = vrot.lane.b32.xlu1 %v734_v15, %s660_s23  ;;  %s668_s28 = smov 17   ;;  %vm829_vm14 = vmand %vm89_vm0, %vm716_vm3  ;;  %vm189_vm15 = vcmask 130048  }
  0x17   :  { %278 = vrot.lane.b32.xlu0 %v232_v17, %s660_s23  ;;  %274 = vrot.lane.b32.xlu1 %v736_v16, %s660_s23 }
  0x1b   :  { %259 = vrot.lane.b32.xlu0 %v734_v15, %s661_s0  ;;  %261 = vrot.lane.b32.xlu1 %v232_v17, %s661_s0 }
  0x1f   :  { %257 = vrot.lane.b32.xlu0 %v736_v16, %s661_s0  ;;  %240 = vrot.lane.b32.xlu1 %v734_v15, %s662_s24 }
  0x23   :  { %242 = vrot.lane.b32.xlu0 %v232_v17, %s662_s24  ;;  %238 = vrot.lane.b32.xlu1 %v736_v16, %s662_s24 }
  0x27   :  { %221 = vrot.lane.b32.xlu0 %v736_v16, %s663_s25  ;;  %223 = vrot.lane.b32.xlu1 %v734_v15, %s663_s25 }
  0x2b   :  { %204 = vrot.lane.b32.xlu1 %v736_v16, %s664_s26  ;;  %219 = vrot.lane.b32.xlu0 %v154_v18, %s663_s25 }
  0x2f   :  { %202 = vrot.lane.b32.xlu1 %v154_v18, %s664_s26  ;;  %206 = vrot.lane.b32.xlu0 %v734_v15, %s664_s26 }
  0x33   :  { %187 = vrot.lane.b32.xlu1 %v734_v15, %s667_s27  ;;  %185 = vrot.lane.b32.xlu0 %v736_v16, %s667_s27 }
  0x37   :  { %168 = vrot.lane.b32.xlu1 %v736_v16, %s668_s28  ;;  %183 = vrot.lane.b32.xlu0 %v154_v18, %s667_s27 }
  0x3b   :  { %166 = vrot.lane.b32.xlu1 %v154_v18, %s668_s28  ;;  %170 = vrot.lane.b32.xlu0 %v734_v15, %s668_s28 }
  0x3f   :  { %308 = vperm.xlu0 %654, %v98_v4  }
  0x81   :  { %v296_v21 = vpop.permute.xlu0 %295  ;;  %v294_v22 = vpop.permute.xlu1 %293 }
  0x82   :  { %v300_v27 = vsel %vm299_vm7, %v294_v22, %v296_v21 }
  0x85   :  { %v298_v24 = vpop.permute.xlu0 %297  ;;  %v277_v25 = vpop.permute.xlu1 %276 }
  0x86   :  { %v301_v26 = vsel %vm299_vm7, %v296_v21, %v298_v24 }
  0x87   :  { %610 = vmatprep.subr.msk.mxu0 %vm783_vm6, %v301_v26 }
  0x88   :  { %611 = vmatpush1.msk.msra.mxu0 %vm716_vm3, %v300_v27 }
  0x89   :  { %v279_v28 = vpop.permute.xlu0 %278  ;;  %v275_v29 = vpop.permute.xlu1 %274 }
  0x8a   :  { %v282_v30 = vsel %vm280_vm8, %v277_v25, %v279_v28  ;;  %v281_v31 = vsel %vm280_vm8, %v275_v29, %v277_v25 }
  0x8b   :  { %612 = vmatprep.subr.msk.mxu0 %vm92_vm1, %v282_v30 }
  0x8c   :  { %332 = vmatpush1.msra.mxu0 %v281_v31 }
  0x8d   :  { %v260_v33 = vpop.permute.xlu0 %259  ;;  %v262_v34 = vpop.permute.xlu1 %261 }
  0x8e   :  { %v265_v35 = vsel %vm263_vm9, %v260_v33, %v262_v34 }
  0x8f   :  { %613 = vmatprep.subr.msk.mxu0 %vm801_vm10, %v265_v35 }
  0x91   :  { %v258_v36 = vpop.permute.xlu0 %257  ;;  %v241_v37 = vpop.permute.xlu1 %240 }
  0x92   :  { %v264_v38 = vsel %vm263_vm9, %v258_v36, %v260_v33 }
  0x93   :  { %614 = vmatpush1.msk.msra.mxu0 %vm712_vm2, %v264_v38 }
  0x95   :  { %v243_v39 = vpop.permute.xlu0 %242  ;;  %v239_v40 = vpop.permute.xlu1 %238 }
  0x96   :  { %v246_v41 = vsel %vm954_vm11, %v241_v37, %v243_v39  ;;  %v245_v42 = vsel %vm954_vm11, %v239_v40, %v241_v37  ;;  %vm311_vm11 = vcmask 588800  }
  0x97   :  { %615 = vmatprep.subr.msk.mxu0 %vm724_vm5, %v246_v41 }
  0x98   :  { %616 = vmatpush1.msk.msra.mxu0 %vm716_vm3, %v245_v42 }
  0x99   :  { %v222_v43 = vpop.permute.xlu0 %221  ;;  %337 = vmatprep.subr.mxu0 %v734_v15  ;;  %v224_v44 = vpop.permute.xlu1 %223 }
  0x9a   :  { %338 = vmatpush1.msra.mxu0 %v736_v16  ;;  %v227_v45 = vsel %vm953_vm12, %v222_v43, %v224_v44 }
  0x9b   :  { %617 = vmatprep.subr.msk.mxu0 %vm720_vm4, %v227_v45 }
  0x9d   :  { %v205_v46 = vpop.permute.xlu1 %204  ;;  %v220_v47 = vpop.permute.xlu0 %219 }
  0x9e   :  { %v226_v48 = vsel %vm953_vm12, %v220_v47, %v222_v43  ;;  %vm847_vm12 = vmand %vm89_vm0, %vm712_vm2 }
  0x9f   :  { %618 = vmatpush1.msk.msra.mxu0 %vm712_vm2, %v226_v48 }
  0xa1   :  { %v203_v49 = vpop.permute.xlu1 %202  ;;  %v207_v50 = vpop.permute.xlu0 %206 }
  0xa2   :  { %v209_v52 = vsel %vm952_vm13, %v203_v49, %v205_v46  ;;  %v210_v53 = vsel %vm952_vm13, %v205_v46, %v207_v50  ;;  %vm172_vm13 = vcmask 138240  }
  0xa3   :  { %619 = vmatprep.subr.msk.mxu0 %vm724_vm5, %v210_v53 }
  0xa4   :  { %620 = vmatpush1.msk.msra.mxu0 %vm829_vm14, %v209_v52 }
  0xa5   :  { %v188_v54 = vpop.permute.xlu1 %187  ;;  %v186_v55 = vpop.permute.xlu0 %185 }
  0xa6   :  { %v191_v56 = vsel %vm189_vm15, %v186_v55, %v188_v54 }
  0xa7   :  { %343 = vmatprep.subr.mxu0 %v191_v56 }
  0xa9   :  { %v169_v57 = vpop.permute.xlu1 %168  ;;  %v184_v58 = vpop.permute.xlu0 %183 }
  0xaa   :  { %v190_v59 = vsel %vm189_vm15, %v184_v58, %v186_v55 }
  0xab   :  { %621 = vmatpush1.msk.msra.mxu0 %vm89_vm0, %v190_v59 }
  0xad   :  { %v167_v60 = vpop.permute.xlu1 %166  ;;  %v171_v61 = vpop.permute.xlu0 %170 }
  0xae   :  { %v173_v63 = vsel %vm172_vm13, %v167_v60, %v169_v57  ;;  %v174_v0 = vsel %vm172_vm13, %v169_v57, %v171_v61 }
  0xaf   :  { %622 = vmatprep.subr.msk.mxu0 %vm720_vm4, %v174_v0 }
  0xb0   :  { %623 = vmatpush1.msk.msra.mxu0 %vm847_vm12, %v173_v63 }
  0xb1   :  { %624 = vmatmul.mubr.msk.f32.vlgmr.msra.gmra.mxu0 %vm311_vm11, %v698_v3 }
  0xba   :  { %v859_v1 = vpop.permute.xlu0 %308 }
 0x171   :  { %v381_v2 = vpop.f32.mrf.mxu0 }
 0x172   :  { %v382_v4 = vadd.f32 %v381_v2, %v859_v1 }
 0x173   :  { %v383_v7 = vpop.f32.mrf.mxu0 }
 0x174   :  { %v386_v8 = vmax.f32 %v382_v4, 0.0  ;;  %v384_v13 = vadd.f32 %v383_v7, %v859_v1 }
 0x176   :  { %388 = vst [vmem:[%s951_s3] sm:$0xff] %v386_v8  ;;  %v387_v14 = vmax.f32 %v384_v13, 0.0 }
 0x178   :  { %389 = vst [vmem:[%s951_s3 + $0x8] sm:$0xff] %v387_v14 }
 0x179   :  { %657 = dma.done.wait [#allocation3 + $0x1], 256 }
 0x17a   :  { %658 = vsyncadd [#allocation3 + $0x1], 4294967040  ;;  %561 = vmatprep.mubr.f32.mxu1 %v665_v19  ;;  %v395_v15 = vld [vmem:[#allocation2 + $0x28] sm:$0xff]  ;;  %v394_v16 = vld [vmem:[#allocation2 + $0x30] sm:$0xff] }
 0x17b   :  { %487 = vrot.lane.b32.xlu0 %v395_v15, %s659_s22  ;;  %485 = vrot.lane.b32.xlu1 %v394_v16, %s659_s22  ;;  %v447_v17 = vld [vmem:[#allocation2 + $0x38] sm:$0xff] }
 0x17c   :  { %v393_v18 = vld [vmem:[#allocation2 + $0x18] sm:$0xff] }
 0x17f   :  { %489 = vrot.lane.b32.xlu0 %v447_v17, %s659_s22  ;;  %475 = vrot.lane.b32.xlu1 %v395_v15, %s660_s23 }
 0x183   :  { %477 = vrot.lane.b32.xlu0 %v447_v17, %s660_s23  ;;  %473 = vrot.lane.b32.xlu1 %v394_v16, %s660_s23 }
 0x187   :  { %463 = vrot.lane.b32.xlu0 %v395_v15, %s661_s0  ;;  %465 = vrot.lane.b32.xlu1 %v447_v17, %s661_s0 }
 0x18b   :  { %461 = vrot.lane.b32.xlu0 %v394_v16, %s661_s0  ;;  %451 = vrot.lane.b32.xlu1 %v395_v15, %s662_s24 }
 0x18f   :  { %453 = vrot.lane.b32.xlu0 %v447_v17, %s662_s24  ;;  %449 = vrot.lane.b32.xlu1 %v394_v16, %s662_s24 }
 0x193   :  { %437 = vrot.lane.b32.xlu0 %v394_v16, %s663_s25  ;;  %439 = vrot.lane.b32.xlu1 %v395_v15, %s663_s25 }
 0x197   :  { %425 = vrot.lane.b32.xlu1 %v394_v16, %s664_s26  ;;  %435 = vrot.lane.b32.xlu0 %v393_v18, %s663_s25 }
 0x19b   :  { %423 = vrot.lane.b32.xlu1 %v393_v18, %s664_s26  ;;  %427 = vrot.lane.b32.xlu0 %v395_v15, %s664_s26 }
 0x19f   :  { %415 = vrot.lane.b32.xlu1 %v395_v15, %s667_s27  ;;  %413 = vrot.lane.b32.xlu0 %v394_v16, %s667_s27 }
 0x1a3   :  { %401 = vrot.lane.b32.xlu1 %v394_v16, %s668_s28  ;;  %411 = vrot.lane.b32.xlu0 %v393_v18, %s667_s27 }
 0x1a7   :  { %399 = vrot.lane.b32.xlu1 %v393_v18, %s668_s28  ;;  %403 = vrot.lane.b32.xlu0 %v395_v15, %s668_s28 }
 0x1ed   :  { %v488_v19 = vpop.permute.xlu0 %487  ;;  %v486_v20 = vpop.permute.xlu1 %485 }
 0x1ee   :  { %v491_v25 = vsel %vm299_vm7, %v486_v20, %v488_v19 }
 0x1f1   :  { %v490_v21 = vpop.permute.xlu0 %489  ;;  %v476_v22 = vpop.permute.xlu1 %475 }
 0x1f2   :  { %v492_v24 = vsel %vm299_vm7, %v488_v19, %v490_v21  ;;  %vm973_vm7 = vcmask 7168  }
 0x1f3   :  { %625 = vmatprep.subr.msk.mxu1 %vm783_vm6, %v492_v24  ;;  %vm971_vm6 = vcmask 1039360  }
 0x1f4   :  { %626 = vmatpush1.msk.msra.mxu1 %vm716_vm3, %v491_v25 }
 0x1f5   :  { %v478_v26 = vpop.permute.xlu0 %477  ;;  %v474_v27 = vpop.permute.xlu1 %473 }
 0x1f6   :  { %v480_v28 = vsel %vm280_vm8, %v476_v22, %v478_v26  ;;  %v479_v29 = vsel %vm280_vm8, %v474_v27, %v476_v22  ;;  %vm974_vm8 = vmmov %vm973_vm7 }
 0x1f7   :  { %627 = vmatprep.subr.msk.mxu1 %vm92_vm1, %v480_v28  ;;  %vm972_vm1 = vmmov %vm971_vm6 }
 0x1f8   :  { %514 = vmatpush1.msra.mxu1 %v479_v29 }
 0x1f9   :  { %v464_v30 = vpop.permute.xlu0 %463  ;;  %v466_v31 = vpop.permute.xlu1 %465 }
 0x1fa   :  { %v468_v23 = vsel %vm263_vm9, %v464_v30, %v466_v31 }
 0x1fb   :  { %628 = vmatprep.subr.msk.mxu1 %vm801_vm10, %v468_v23 }
 0x1fd   :  { %v462_v33 = vpop.permute.xlu0 %461  ;;  %v452_v34 = vpop.permute.xlu1 %451 }
 0x1fe   :  { %v467_v35 = vsel %vm263_vm9, %v462_v33, %v464_v30  ;;  %vm975_vm9 = vcmask 121856  }
 0x1ff   :  { %629 = vmatpush1.msk.msra.mxu1 %vm712_vm2, %v467_v35 }
 0x201   :  { %v454_v36 = vpop.permute.xlu0 %453  ;;  %v450_v37 = vpop.permute.xlu1 %449 }
 0x202   :  { %v456_v6 = vsel %vm971_vm6, %v452_v34, %v454_v36  ;;  %v455_v38 = vsel %vm972_vm1, %v450_v37, %v452_v34 }
 0x203   :  { %630 = vmatprep.subr.msk.mxu1 %vm724_vm5, %v456_v6 }
 0x204   :  { %631 = vmatpush1.msk.msra.mxu1 %vm716_vm3, %v455_v38  ;;  %vm976_vm3 = vmmov %vm975_vm9 }
 0x205   :  { %v438_v32 = vpop.permute.xlu0 %437  ;;  %519 = vmatprep.subr.mxu1 %v395_v15  ;;  %v440_v39 = vpop.permute.xlu1 %439 }
 0x206   :  { %v442_v40 = vsel %vm973_vm7, %v438_v32, %v440_v39  ;;  %520 = vmatpush1.msra.mxu1 %v394_v16 }
 0x207   :  { %632 = vmatprep.subr.msk.mxu1 %vm720_vm4, %v442_v40 }
 0x209   :  { %v426_v41 = vpop.permute.xlu1 %425  ;;  %v436_v42 = vpop.permute.xlu0 %435 }
 0x20a   :  { %v441_v43 = vsel %vm974_vm8, %v436_v42, %v438_v32 }
 0x20b   :  { %633 = vmatpush1.msk.msra.mxu1 %vm712_vm2, %v441_v43 }
 0x20d   :  { %v424_v44 = vpop.permute.xlu1 %423  ;;  %v428_v45 = vpop.permute.xlu0 %427 }
 0x20e   :  { %v429_v10 = vsel %vm975_vm9, %v424_v44, %v426_v41  ;;  %v430_v46 = vsel %vm976_vm3, %v426_v41, %v428_v45 }
 0x20f   :  { %634 = vmatprep.subr.msk.mxu1 %vm724_vm5, %v430_v46 }
 0x210   :  { %635 = vmatpush1.msk.msra.mxu1 %vm829_vm14, %v429_v10 }
 0x211   :  { %v416_v47 = vpop.permute.xlu1 %415  ;;  %v414_v48 = vpop.permute.xlu0 %413 }
 0x212   :  { %v418_v49 = vsel %vm189_vm15, %v414_v48, %v416_v47 }
 0x213   :  { %525 = vmatprep.subr.mxu1 %v418_v49 }
 0x215   :  { %v402_v50 = vpop.permute.xlu1 %401  ;;  %v412_v9 = vpop.permute.xlu0 %411 }
 0x216   :  { %v417_v52 = vsel %vm189_vm15, %v412_v9, %v414_v48 }
 0x217   :  { %636 = vmatpush1.msk.msra.mxu1 %vm89_vm0, %v417_v52 }
 0x219   :  { %v400_v53 = vpop.permute.xlu1 %399  ;;  %v404_v54 = vpop.permute.xlu0 %403 }
 0x21a   :  { %v405_v12 = vsel %vm172_vm13, %v400_v53, %v402_v50  ;;  %v406_v55 = vsel %vm172_vm13, %v402_v50, %v404_v54 }
 0x21b   :  { %637 = vmatprep.subr.msk.mxu1 %vm720_vm4, %v406_v55 }
 0x21c   :  { %638 = vmatpush1.msk.msra.mxu1 %vm847_vm12, %v405_v12 }
 0x21d   :  { %639 = vmatmul.mubr.msk.f32.vlgmr.msra.gmra.mxu1 %vm311_vm11, %v698_v3 }
 0x2dd   :  { %v563_v51 = vpop.f32.mrf.mxu1 }
 0x2de   :  { %v564_v56 = vadd.f32 %v563_v51, %v859_v1 }
 0x2df   :  { %v565_v5 = vpop.f32.mrf.mxu1 }
 0x2e0   :  { %v568_v57 = vmax.f32 %v564_v56, 0.0  ;;  %v566_v58 = vadd.f32 %v565_v5, %v859_v1 }
 0x2e2   :  { %640 = vst [vmem:[%s951_s3 + $0x10] sm:$0xff] %v568_v57  ;;  %v569_v59 = vmax.f32 %v566_v58, 0.0 }
 0x2e4   :  { %641 = vst [vmem:[%s951_s3 + $0x18] sm:$0xff] %v569_v59 }
 0x2e5   :  { %577 = vsyncmov [#allocation3] }
 0x2e8   :  { %s578_s10 = vpop.sfrf %577 }
 0x2e9   :  { %p642_p0 = scmp.ne.s32.totalorder %s578_s10, 0 }
 0x2eb   :  { %582 = shalt.err (%p642_p0)  }
 0x2ec   :  { %584 = vsyncmov [#allocation3 + $0x1] }
 0x2ef   :  { %s585_s11 = vpop.sfrf %584 }
 0x2f0   :  { %p643_p1 = scmp.ne.s32.totalorder %s585_s11, 0 }
 0x2f2   :  { %589 = shalt.err (%p643_p1)  }

</bundles_post_ra>
